<compile_context>
chip_gen: v6e
topology: v6e:2x2x1
jax: 0.10.0
libtpu: 0.0.40
codegen_flags: <defaults>
</compile_context>

<pallas_src>
import numpy as np
import jax
import jax.numpy as jnp
from jax.experimental import pallas as pl
from jax.experimental.pallas import tpu as pltpu

RRELU_SLOPE = (1.0 / 8.0 + 1.0 / 3.0) / 2.0  # nn.RReLU() eval-mode negative slope
BN_EPS = 1e-5                                 # nn.BatchNorm1d default eps


def _invariant_spec(shape):
    zeros = (0,) * len(shape)
    return pl.BlockSpec(shape, lambda b, t, zeros=zeros: zeros)


# --------------------------------------------------------------------------
# Fused per-time-step kernel: 2-layer LSTM cell + conv1 accumulate; epilogue
# (RReLU -> MaxPool -> conv2 -> RReLU -> BatchNorm) under pl.when(t == L-1).
# --------------------------------------------------------------------------
def fused_step_kernel(x_ref, wih0_ref, whh0_ref, b0_ref,
                      wih1_ref, whh1_ref, b1_ref,
                      w1op_ref, b1e_ref, w2op_ref, b2e_ref,
                      bn_scale_ref, bn_shift_ref,
                      out_ref,
                      h0_ref, c0_ref, h1_ref, c1_ref, acc_ref):
    t = pl.program_id(1)
    H = whh0_ref.shape[0]

    @pl.when(t == 0)
    def _():
        h0_ref[...] = jnp.zeros_like(h0_ref)
        c0_ref[...] = jnp.zeros_like(c0_ref)
        h1_ref[...] = jnp.zeros_like(h1_ref)
        c1_ref[...] = jnp.zeros_like(c1_ref)
        acc_ref[...] = jnp.zeros_like(acc_ref)   # conv1 bias added in epilogue

    def lstm_cell(x_t, h, c, wih_ref, whh_ref, b_ref):
        # Single fused gate matmul pair: (B, 4H), PyTorch gate order i|f|g|o.
        g = (jnp.dot(x_t, wih_ref[...], preferred_element_type=jnp.float32)
             + jnp.dot(h, whh_ref[...], preferred_element_type=jnp.float32)
             + b_ref[...])
        # g-gate columns were pre-scaled by 2 host-side, so one full-width
        # sigmoid covers all four gates: tanh(z) = 2*sigmoid(2z) - 1.
        sg = jax.nn.sigmoid(g)
        i = sg[:, 0:H]
        f = sg[:, H:2 * H]
        gc = 2.0 * sg[:, 2 * H:3 * H] - 1.0
        o = sg[:, 3 * H:4 * H]
        c_new = f * c + i * gc
        h_new = o * jnp.tanh(c_new)
        return h_new, c_new

    x_t = x_ref[...]                                               # (BB, E)
    h0, c0 = lstm_cell(x_t, h0_ref[...], c0_ref[...], wih0_ref, whh0_ref, b0_ref)
    h0_ref[...] = h0
    c0_ref[...] = c0
    # (LSTM inter-layer dropout p=0.2 is identity in eval mode)
    h1, c1 = lstm_cell(h0, h1_ref[...], c1_ref[...], wih1_ref, whh1_ref, b1_ref)
    h1_ref[...] = h1
    c1_ref[...] = c1

    # conv1 as a dense operator: channel t of the (maxlength, s, s) image is h1
    # at step t, so its contribution is accumulated immediately with this step's
    # streamed bf16 operator slice (DMA overlapped with the serial recurrence).
    acc_ref[...] += jnp.dot(h1.astype(w1op_ref.dtype), w1op_ref[...],
                            preferred_element_type=jnp.float32)

    @pl.when(t == pl.num_programs(1) - 1)
    def _():
        N1 = acc_ref.shape[1]
        NP = N1 // 4
        # dropout (identity, eval) -> conv1 bias -> RReLU (eval slope)
        y1 = acc_ref[...] + b1e_ref[...]
        y1 = jnp.where(y1 >= 0, y1, y1 * RRELU_SLOPE)
        # MaxPool2d(2, 2): columns ordered (pool-offset k, co, ph, qh) with k
        # major, so pooling is a max over four aligned NP-lane blocks.
        pooled = jnp.maximum(jnp.maximum(y1[:, 0:NP], y1[:, NP:2 * NP]),
                             jnp.maximum(y1[:, 2 * NP:3 * NP], y1[:, 3 * NP:4 * NP]))
        # dropout (identity) -> conv2 as dense operator + bias -> RReLU
        y2 = (jnp.dot(pooled.astype(w2op_ref.dtype), w2op_ref[...],
                      preferred_element_type=jnp.float32) + b2e_ref[...])
        y2 = jnp.where(y2 >= 0, y2, y2 * RRELU_SLOPE)   # NCHW flatten, 128-padded
        # BatchNorm1d (eval, running stats) pre-folded to scale/shift; final
        # dropout identity.  Full-width lane-dense store (padded to 128 lanes).
        out_ref[...] = y2 * bn_scale_ref[...] + bn_shift_ref[...]


def lstm_cnn_encoder_pallas(x, params):
    L, B_pad, E = x.shape
    H = params["whh0"].shape[0]
    Hp = params["conv2_op"].shape[1]                # 128-lane padded hidden
    _, SS, N1 = params["conv1_op"].shape
    BB = B_pad if B_pad <= 128 else 128             # batch block (per-core work)
    assert B_pad % BB == 0
    GB = B_pad // BB

    args = (x, params["wih0"], params["whh0"], params["b0"],
            params["wih1"], params["whh1"], params["b1"],
            params["conv1_op"], params["conv1_bias"],
            params["conv2_op"], params["conv2_bias"],
            params["bn_scale"], params["bn_shift"])

    grid_spec = pltpu.PrefetchScalarGridSpec(
        num_scalar_prefetch=0,
        grid=(GB, L),
        in_specs=[
            pl.BlockSpec((None, BB, E), lambda b, t: (t, b, 0)),   # x_t stream
            _invariant_spec(params["wih0"].shape),
            _invariant_spec(params["whh0"].shape),
            _invariant_spec(params["b0"].shape),
            _invariant_spec(params["wih1"].shape),
            _invariant_spec(params["whh1"].shape),
            _invariant_spec(params["b1"].shape),
            pl.BlockSpec((None, SS, N1), lambda b, t: (t, 0, 0)),  # conv1 op stream
            _invariant_spec(params["conv1_bias"].shape),
            _invariant_spec(params["conv2_op"].shape),
            _invariant_spec(params["conv2_bias"].shape),
            _invariant_spec(params["bn_scale"].shape),
            _invariant_spec(params["bn_shift"].shape),
        ],
        out_specs=pl.BlockSpec((BB, Hp), lambda b, t: (b, 0)),     # resident over t
        scratch_shapes=[
            pltpu.VMEM((BB, H), jnp.float32),    # h0
            pltpu.VMEM((BB, H), jnp.float32),    # c0
            pltpu.VMEM((BB, H), jnp.float32),    # h1
            pltpu.VMEM((BB, H), jnp.float32),    # c1
            pltpu.VMEM((BB, N1), jnp.float32),   # conv1 accumulator
        ],
    )

    return pl.pallas_call(
        fused_step_kernel,
        out_shape=jax.ShapeDtypeStruct((B_pad, Hp), jnp.float32),
        grid_spec=grid_spec,
        compiler_params=pltpu.CompilerParams(
            dimension_semantics=("parallel", "arbitrary")),
    )(*args)


# --------------------------------------------------------------------------
# Host-side parameter preparation (conv weights -> dense conv operators)
# --------------------------------------------------------------------------
def _conv1_operator(w1, b1, maxlength, s):
    """Scatter PyTorch OIHW conv1 weight (16, maxlength, 3, 3) into a dense
    operator (maxlength, s*s, 4*16*(s//2)**2) acting on the flattened LSTM
    output.  Columns ordered (pool-offset k=(P%2)*2+(Q%2), out-channel,
    pooled-row, pooled-col) so 2x2 max-pooling is a block-wise lane max."""
    co_n = w1.shape[0]
    hs = s // 2
    grp = co_n * hs * hs
    w1 = np.asarray(w1, np.float32)
    op = np.zeros((maxlength, s * s, 4 * grp), np.float32)
    for co in range(co_n):
        for t in range(maxlength):
            for dh in range(3):
                for dw in range(3):
                    wv = w1[co, t, dh, dw]
                    for P in range(s):
                        p = P + dh - 1
                        if p < 0 or p >= s:
                            continue
                        for Q in range(s):
                            q = Q + dw - 1
                            if q < 0 or q >= s:
                                continue
                            k = (P % 2) * 2 + (Q % 2)
                            col = k * grp + co * hs * hs + (P // 2) * hs + (Q // 2)
                            op[t, p * s + q, col] = wv
    bias = np.tile(np.repeat(np.asarray(b1, np.float32), hs * hs), 4)[None, :]
    return jnp.asarray(op, jnp.bfloat16), jnp.asarray(bias)


def _conv2_operator(w2, b2, hs, Hp):
    """Dense operator (16*hs*hs, Hp) for conv2 on the pooled NCHW-flattened
    input; output columns [0:H] are the PyTorch NCHW flatten == .view(B, hidden),
    columns [H:Hp] are zero padding for a lane-dense 128-wide output slab."""
    co_n, ci_n = w2.shape[0], w2.shape[1]
    H = co_n * hs * hs
    w2 = np.asarray(w2, np.float32)
    op = np.zeros((ci_n * hs * hs, Hp), np.float32)
    for co in range(co_n):
        for ci in range(ci_n):
            for dh in range(3):
                for dw in range(3):
                    wv = w2[co, ci, dh, dw]
                    for P in range(hs):
                        p = P + dh - 1
                        if p < 0 or p >= hs:
                            continue
                        for Q in range(hs):
                            q = Q + dw - 1
                            if q < 0 or q >= hs:
                                continue
                            op[ci * hs * hs + p * hs + q,
                               co * hs * hs + P * hs + Q] = wv
    bias = np.zeros((1, Hp), np.float32)
    bias[0, :H] = np.repeat(np.asarray(b2, np.float32), hs * hs)
    return jnp.asarray(op, jnp.bfloat16), jnp.asarray(bias)


def init_params(key, hidden_size, embed_size, dict_size, maxlength):
    H, E = hidden_size, embed_size
    s = int(round(H ** 0.5))
    assert s * s == H and s % 2 == 0, "hidden_size must be an even perfect square"
    Hp = ((H + 127) // 128) * 128
    keys = jax.random.split(key, 8)

    def u(kk, shape, bound):
        return jax.random.uniform(kk, shape, jnp.float32, -bound, bound)

    params = {}
    params["embed"] = jax.random.normal(keys[0], (dict_size, E), jnp.float32)

    kb = 1.0 / (H ** 0.5)

    def lstm_layer(kk, in_dim):
        k1, k2, k3, k4 = jax.random.split(kk, 4)
        w_ih = u(k1, (4 * H, in_dim), kb)    # PyTorch (4H, in), gate order i,f,g,o
        w_hh = u(k2, (4 * H, H), kb)
        b_ih = u(k3, (4 * H,), kb)
        b_hh = u(k4, (4 * H,), kb)
        # packed as (in, 4H)/(H, 4H) for one fused gate matmul; biases pre-summed.
        wih = np.array(w_ih.T, np.float32)
        whh = np.array(w_hh.T, np.float32)
        b = np.array(b_ih + b_hh, np.float32).reshape(1, 4 * H)
        # Pre-scale the cell-candidate (g) gate columns by 2 so the kernel can
        # use a single full-width sigmoid: tanh(z) = 2*sigmoid(2z) - 1.
        gsl = slice(2 * H, 3 * H)
        wih[:, gsl] *= 2.0
        whh[:, gsl] *= 2.0
        b[:, gsl] *= 2.0
        return jnp.asarray(wih), jnp.asarray(whh), jnp.asarray(b)

    params["wih0"], params["whh0"], params["b0"] = lstm_layer(keys[1], E)
    params["wih1"], params["whh1"], params["b1"] = lstm_layer(keys[2], H)

    # conv1: PyTorch OIHW (16, maxlength, 3, 3)
    s1 = 1.0 / ((maxlength * 9) ** 0.5)
    w1 = u(keys[3], (16, maxlength, 3, 3), s1)
    b1 = u(keys[4], (16,), s1)
    params["conv1_op"], params["conv1_bias"] = _conv1_operator(w1, b1, maxlength, s)

    # conv2: PyTorch OIHW (4, 16, 3, 3)
    s2 = 1.0 / ((16 * 9) ** 0.5)
    w2 = u(keys[5], (4, 16, 3, 3), s2)
    b2 = u(keys[6], (4,), s2)
    params["conv2_op"], params["conv2_bias"] = _conv2_operator(w2, b2, s // 2, Hp)

    # BatchNorm1d(hidden) eval-mode folded to scale/shift (defaults: weight=1,
    # bias=0, running_mean=0, running_var=1), zero-padded to Hp lanes.
    gamma = np.ones(H, np.float32)
    beta = np.zeros(H, np.float32)
    mean = np.zeros(H, np.float32)
    var = np.ones(H, np.float32)
    scale = gamma / np.sqrt(var + BN_EPS)
    shift = beta - mean * scale
    bn_scale = np.zeros((1, Hp), np.float32)
    bn_shift = np.zeros((1, Hp), np.float32)
    bn_scale[0, :H] = scale
    bn_shift[0, :H] = shift
    params["bn_scale"] = jnp.asarray(bn_scale)
    params["bn_shift"] = jnp.asarray(bn_shift)
    return params


# --------------------------------------------------------------------------
# Full forward (only the embedding gather remains outside the fused kernel)
# --------------------------------------------------------------------------
@jax.jit
def lstm_cnn_encoder_forward(seq, params):
    B, L = seq.shape
    H = params["whh0"].shape[0]
    # Pad batch to a sublane-aligned multiple of 8 (multiple of 128 when large)
    # so MXU/LHS rows are aligned; padded rows are independent and sliced off.
    B_pad = max(8, -(-B // 8) * 8)
    if B_pad > 128:
        B_pad = -(-B_pad // 128) * 128
    seq_p = jnp.pad(seq, ((0, B_pad - B), (0, 0)))
    # Embedding lookup (usingw2v=False): data-dependent gather kept in XLA.
    x = jnp.take(params["embed"], seq_p.T, axis=0)      # (L, B_pad, E), time-major
    out = lstm_cnn_encoder_pallas(x, params)            # (B_pad, Hp)
    return out[:B, :H]


if __name__ == "__main__":
    HIDDEN, BATCH, EMBED, DICT, MAXLEN = 64, 2, 16, 100, 8  # hidden = 8*8 (even square)
    key = jax.random.PRNGKey(0)
    pkey, skey = jax.random.split(key)
    params = init_params(pkey, HIDDEN, EMBED, DICT, MAXLEN)
    seq = jax.random.randint(skey, (BATCH, MAXLEN), 0, DICT, dtype=jnp.int32)

    out = lstm_cnn_encoder_forward(seq, params)
    out = jax.block_until_ready(out)
    assert out.shape == (BATCH, HIDDEN), out.shape
    assert bool(jnp.all(jnp.isfinite(out)))
    print("KERNEL_OK")
</pallas_src>

<mosaic_0001>
module attributes {stable_mosaic.version = 11 : i64} {
  func.func @fused_step_kernel(%arg0: i32, %arg1: i32, %arg2: memref<1x8x16xf32, #tpu.memory_space<vmem>>, %arg3: memref<16x256xf32, #tpu.memory_space<vmem>>, %arg4: memref<64x256xf32, #tpu.memory_space<vmem>>, %arg5: memref<1x256xf32, #tpu.memory_space<vmem>>, %arg6: memref<64x256xf32, #tpu.memory_space<vmem>>, %arg7: memref<64x256xf32, #tpu.memory_space<vmem>>, %arg8: memref<1x256xf32, #tpu.memory_space<vmem>>, %arg9: memref<1x64x1024xbf16, #tpu.memory_space<vmem>>, %arg10: memref<1x1024xf32, #tpu.memory_space<vmem>>, %arg11: memref<256x128xbf16, #tpu.memory_space<vmem>>, %arg12: memref<1x128xf32, #tpu.memory_space<vmem>>, %arg13: memref<1x128xf32, #tpu.memory_space<vmem>>, %arg14: memref<1x128xf32, #tpu.memory_space<vmem>>, %arg15: memref<8x128xf32, #tpu.memory_space<vmem>>, %arg16: memref<8x64xf32, #tpu.memory_space<vmem>>, %arg17: memref<8x64xf32, #tpu.memory_space<vmem>>, %arg18: memref<8x64xf32, #tpu.memory_space<vmem>>, %arg19: memref<8x64xf32, #tpu.memory_space<vmem>>, %arg20: memref<8x1024xf32, #tpu.memory_space<vmem>>) attributes {dimension_semantics = [#tpu.dimension_semantics<parallel>, #tpu.dimension_semantics<arbitrary>], iteration_bounds = array<i64: 1, 8>, scalar_prefetch = 0 : i64, scratch_operands = 5 : i64, tpu.core_type = #tpu.core_type<tc>, window_params = [{transform_indices = @transform_0, window_bounds = array<i64: 1, 8, 16>}, {pipeline_mode = #tpu.pipeline_mode<synchronous>, transform_indices = @transform_1, window_bounds = array<i64: 16, 256>}, {pipeline_mode = #tpu.pipeline_mode<synchronous>, transform_indices = @transform_2, window_bounds = array<i64: 64, 256>}, {pipeline_mode = #tpu.pipeline_mode<synchronous>, transform_indices = @transform_3, window_bounds = array<i64: 1, 256>}, {pipeline_mode = #tpu.pipeline_mode<synchronous>, transform_indices = @transform_4, window_bounds = array<i64: 64, 256>}, {pipeline_mode = #tpu.pipeline_mode<synchronous>, transform_indices = @transform_5, window_bounds = array<i64: 64, 256>}, {pipeline_mode = #tpu.pipeline_mode<synchronous>, transform_indices = @transform_6, window_bounds = array<i64: 1, 256>}, {transform_indices = @transform_7, window_bounds = array<i64: 1, 64, 1024>}, {pipeline_mode = #tpu.pipeline_mode<synchronous>, transform_indices = @transform_8, window_bounds = array<i64: 1, 1024>}, {pipeline_mode = #tpu.pipeline_mode<synchronous>, transform_indices = @transform_9, window_bounds = array<i64: 256, 128>}, {pipeline_mode = #tpu.pipeline_mode<synchronous>, transform_indices = @transform_10, window_bounds = array<i64: 1, 128>}, {pipeline_mode = #tpu.pipeline_mode<synchronous>, transform_indices = @transform_11, window_bounds = array<i64: 1, 128>}, {pipeline_mode = #tpu.pipeline_mode<synchronous>, transform_indices = @transform_12, window_bounds = array<i64: 1, 128>}, {transform_indices = @transform_13, window_bounds = array<i64: 8, 128>}]} {
    %c0_i32 = arith.constant 0 : i32
    %0 = arith.cmpi eq, %arg1, %c0_i32 : i32
    %1 = arith.extui %0 : i1 to i32
    %c0_i32_0 = arith.constant 0 : i32
    %2 = arith.cmpi ne, %1, %c0_i32_0 : i32
    scf.if %2 {
      %cst_49 = arith.constant 0.000000e+00 : f32
      %75 = vector.broadcast %cst_49 : f32 to vector<8x64xf32>
      %c0_50 = arith.constant 0 : index
      %c0_51 = arith.constant 0 : index
      %76 = vector.load %arg16[%c0_50, %c0_51] : memref<8x64xf32, #tpu.memory_space<vmem>>, vector<8x64xf32>
      tpu.vector_store %arg16[%c0_50, %c0_51], %75 {strides = array<i32>} : memref<8x64xf32, #tpu.memory_space<vmem>>, vector<8x64xf32>,
      %cst_52 = arith.constant 0.000000e+00 : f32
      %77 = vector.broadcast %cst_52 : f32 to vector<8x64xf32>
      %c0_53 = arith.constant 0 : index
      %c0_54 = arith.constant 0 : index
      %78 = vector.load %arg17[%c0_53, %c0_54] : memref<8x64xf32, #tpu.memory_space<vmem>>, vector<8x64xf32>
      tpu.vector_store %arg17[%c0_53, %c0_54], %77 {strides = array<i32>} : memref<8x64xf32, #tpu.memory_space<vmem>>, vector<8x64xf32>,
      %cst_55 = arith.constant 0.000000e+00 : f32
      %79 = vector.broadcast %cst_55 : f32 to vector<8x64xf32>
      %c0_56 = arith.constant 0 : index
      %c0_57 = arith.constant 0 : index
      %80 = vector.load %arg18[%c0_56, %c0_57] : memref<8x64xf32, #tpu.memory_space<vmem>>, vector<8x64xf32>
      tpu.vector_store %arg18[%c0_56, %c0_57], %79 {strides = array<i32>} : memref<8x64xf32, #tpu.memory_space<vmem>>, vector<8x64xf32>,
      %cst_58 = arith.constant 0.000000e+00 : f32
      %81 = vector.broadcast %cst_58 : f32 to vector<8x64xf32>
      %c0_59 = arith.constant 0 : index
      %c0_60 = arith.constant 0 : index
      %82 = vector.load %arg19[%c0_59, %c0_60] : memref<8x64xf32, #tpu.memory_space<vmem>>, vector<8x64xf32>
      tpu.vector_store %arg19[%c0_59, %c0_60], %81 {strides = array<i32>} : memref<8x64xf32, #tpu.memory_space<vmem>>, vector<8x64xf32>,
      %cst_61 = arith.constant 0.000000e+00 : f32
      %83 = vector.broadcast %cst_61 : f32 to vector<8x1024xf32>
      %c0_62 = arith.constant 0 : index
      %c0_63 = arith.constant 0 : index
      %84 = vector.load %arg20[%c0_62, %c0_63] : memref<8x1024xf32, #tpu.memory_space<vmem>>, vector<8x1024xf32>
      tpu.vector_store %arg20[%c0_62, %c0_63], %83 {strides = array<i32>} : memref<8x1024xf32, #tpu.memory_space<vmem>>, vector<8x1024xf32>,
    } else {
    }
    %c0 = arith.constant 0 : index
    %c0_1 = arith.constant 0 : index
    %c0_2 = arith.constant 0 : index
    %3 = vector.load %arg2[%c0, %c0_1, %c0_2] : memref<1x8x16xf32, #tpu.memory_space<vmem>>, vector<1x8x16xf32>
    %4 = vector.shape_cast %3 : vector<1x8x16xf32> to vector<8x16xf32>
    %c0_3 = arith.constant 0 : index
    %c0_4 = arith.constant 0 : index
    %5 = vector.load %arg16[%c0_3, %c0_4] : memref<8x64xf32, #tpu.memory_space<vmem>>, vector<8x64xf32>
    %c0_5 = arith.constant 0 : index
    %c0_6 = arith.constant 0 : index
    %6 = vector.load %arg17[%c0_5, %c0_6] : memref<8x64xf32, #tpu.memory_space<vmem>>, vector<8x64xf32>
    %c0_7 = arith.constant 0 : index
    %c0_8 = arith.constant 0 : index
    %7 = vector.load %arg3[%c0_7, %c0_8] : memref<16x256xf32, #tpu.memory_space<vmem>>, vector<16x256xf32>
    %cst = arith.constant dense<0.000000e+00> : vector<8x256xf32>
    %8 = tpu.matmul %4, %7, %cst {dimension_numbers = #tpu.dot_dimension_numbers<[1], [0], [0], [1], [0, 0, 1, 1], [], []>} : vector<8x16xf32>, vector<16x256xf32>, vector<8x256xf32> -> vector<8x256xf32>
    %c0_9 = arith.constant 0 : index
    %c0_10 = arith.constant 0 : index
    %9 = vector.load %arg4[%c0_9, %c0_10] : memref<64x256xf32, #tpu.memory_space<vmem>>, vector<64x256xf32>
    %cst_11 = arith.constant dense<0.000000e+00> : vector<8x256xf32>
    %10 = tpu.matmul %5, %9, %cst_11 {dimension_numbers = #tpu.dot_dimension_numbers<[1], [0], [0], [1], [0, 0, 1, 1], [], []>} : vector<8x64xf32>, vector<64x256xf32>, vector<8x256xf32> -> vector<8x256xf32>
    %11 = arith.addf %8, %10 : vector<8x256xf32>
    %c0_12 = arith.constant 0 : index
    %c0_13 = arith.constant 0 : index
    %12 = vector.load %arg5[%c0_12, %c0_13] : memref<1x256xf32, #tpu.memory_space<vmem>>, vector<1x256xf32>
    %13 = vector.broadcast %12 : vector<1x256xf32> to vector<8x256xf32>
    %14 = arith.addf %11, %13 : vector<8x256xf32>
    %15 = arith.negf %14 : vector<8x256xf32>
    %16 = math.exp %15 : vector<8x256xf32>
    %cst_14 = arith.constant 1.000000e+00 : f32
    %17 = vector.broadcast %cst_14 : f32 to vector<8x256xf32>
    %18 = arith.addf %17, %16 : vector<8x256xf32>
    %19 = arith.divf %17, %18 : vector<8x256xf32>
    %20 = vector.extract_strided_slice %19 {offsets = [0, 0], sizes = [8, 64], strides = [1, 1]} : vector<8x256xf32> to vector<8x64xf32>
    %21 = vector.extract_strided_slice %19 {offsets = [0, 64], sizes = [8, 64], strides = [1, 1]} : vector<8x256xf32> to vector<8x64xf32>
    %22 = vector.extract_strided_slice %19 {offsets = [0, 128], sizes = [8, 64], strides = [1, 1]} : vector<8x256xf32> to vector<8x64xf32>
    %cst_15 = arith.constant 2.000000e+00 : f32
    %23 = vector.broadcast %cst_15 : f32 to vector<8x64xf32>
    %24 = arith.mulf %23, %22 : vector<8x64xf32>
    %cst_16 = arith.constant 1.000000e+00 : f32
    %25 = vector.broadcast %cst_16 : f32 to vector<8x64xf32>
    %26 = arith.subf %24, %25 : vector<8x64xf32>
    %27 = vector.extract_strided_slice %19 {offsets = [0, 192], sizes = [8, 64], strides = [1, 1]} : vector<8x256xf32> to vector<8x64xf32>
    %28 = arith.mulf %21, %6 : vector<8x64xf32>
    %29 = arith.mulf %20, %26 : vector<8x64xf32>
    %30 = arith.addf %28, %29 : vector<8x64xf32>
    %31 = math.tanh %30 : vector<8x64xf32>
    %32 = arith.mulf %27, %31 : vector<8x64xf32>
    %c0_17 = arith.constant 0 : index
    %c0_18 = arith.constant 0 : index
    %33 = vector.load %arg16[%c0_17, %c0_18] : memref<8x64xf32, #tpu.memory_space<vmem>>, vector<8x64xf32>
    tpu.vector_store %arg16[%c0_17, %c0_18], %32 {strides = array<i32>} : memref<8x64xf32, #tpu.memory_space<vmem>>, vector<8x64xf32>,
    %c0_19 = arith.constant 0 : index
    %c0_20 = arith.constant 0 : index
    %34 = vector.load %arg17[%c0_19, %c0_20] : memref<8x64xf32, #tpu.memory_space<vmem>>, vector<8x64xf32>
    tpu.vector_store %arg17[%c0_19, %c0_20], %30 {strides = array<i32>} : memref<8x64xf32, #tpu.memory_space<vmem>>, vector<8x64xf32>,
    %c0_21 = arith.constant 0 : index
    %c0_22 = arith.constant 0 : index
    %35 = vector.load %arg18[%c0_21, %c0_22] : memref<8x64xf32, #tpu.memory_space<vmem>>, vector<8x64xf32>
    %c0_23 = arith.constant 0 : index
    %c0_24 = arith.constant 0 : index
    %36 = vector.load %arg19[%c0_23, %c0_24] : memref<8x64xf32, #tpu.memory_space<vmem>>, vector<8x64xf32>
    %c0_25 = arith.constant 0 : index
    %c0_26 = arith.constant 0 : index
    %37 = vector.load %arg6[%c0_25, %c0_26] : memref<64x256xf32, #tpu.memory_space<vmem>>, vector<64x256xf32>
    %cst_27 = arith.constant dense<0.000000e+00> : vector<8x256xf32>
    %38 = tpu.matmul %32, %37, %cst_27 {dimension_numbers = #tpu.dot_dimension_numbers<[1], [0], [0], [1], [0, 0, 1, 1], [], []>} : vector<8x64xf32>, vector<64x256xf32>, vector<8x256xf32> -> vector<8x256xf32>
    %c0_28 = arith.constant 0 : index
    %c0_29 = arith.constant 0 : index
    %39 = vector.load %arg7[%c0_28, %c0_29] : memref<64x256xf32, #tpu.memory_space<vmem>>, vector<64x256xf32>
    %cst_30 = arith.constant dense<0.000000e+00> : vector<8x256xf32>
    %40 = tpu.matmul %35, %39, %cst_30 {dimension_numbers = #tpu.dot_dimension_numbers<[1], [0], [0], [1], [0, 0, 1, 1], [], []>} : vector<8x64xf32>, vector<64x256xf32>, vector<8x256xf32> -> vector<8x256xf32>
    %41 = arith.addf %38, %40 : vector<8x256xf32>
    %c0_31 = arith.constant 0 : index
    %c0_32 = arith.constant 0 : index
    %42 = vector.load %arg8[%c0_31, %c0_32] : memref<1x256xf32, #tpu.memory_space<vmem>>, vector<1x256xf32>
    %43 = vector.broadcast %42 : vector<1x256xf32> to vector<8x256xf32>
    %44 = arith.addf %41, %43 : vector<8x256xf32>
    %45 = arith.negf %44 : vector<8x256xf32>
    %46 = math.exp %45 : vector<8x256xf32>
    %cst_33 = arith.constant 1.000000e+00 : f32
    %47 = vector.broadcast %cst_33 : f32 to vector<8x256xf32>
    %48 = arith.addf %47, %46 : vector<8x256xf32>
    %49 = arith.divf %47, %48 : vector<8x256xf32>
    %50 = vector.extract_strided_slice %49 {offsets = [0, 0], sizes = [8, 64], strides = [1, 1]} : vector<8x256xf32> to vector<8x64xf32>
    %51 = vector.extract_strided_slice %49 {offsets = [0, 64], sizes = [8, 64], strides = [1, 1]} : vector<8x256xf32> to vector<8x64xf32>
    %52 = vector.extract_strided_slice %49 {offsets = [0, 128], sizes = [8, 64], strides = [1, 1]} : vector<8x256xf32> to vector<8x64xf32>
    %cst_34 = arith.constant 2.000000e+00 : f32
    %53 = vector.broadcast %cst_34 : f32 to vector<8x64xf32>
    %54 = arith.mulf %53, %52 : vector<8x64xf32>
    %cst_35 = arith.constant 1.000000e+00 : f32
    %55 = vector.broadcast %cst_35 : f32 to vector<8x64xf32>
    %56 = arith.subf %54, %55 : vector<8x64xf32>
    %57 = vector.extract_strided_slice %49 {offsets = [0, 192], sizes = [8, 64], strides = [1, 1]} : vector<8x256xf32> to vector<8x64xf32>
    %58 = arith.mulf %51, %36 : vector<8x64xf32>
    %59 = arith.mulf %50, %56 : vector<8x64xf32>
    %60 = arith.addf %58, %59 : vector<8x64xf32>
    %61 = math.tanh %60 : vector<8x64xf32>
    %62 = arith.mulf %57, %61 : vector<8x64xf32>
    %c0_36 = arith.constant 0 : index
    %c0_37 = arith.constant 0 : index
    %63 = vector.load %arg18[%c0_36, %c0_37] : memref<8x64xf32, #tpu.memory_space<vmem>>, vector<8x64xf32>
    tpu.vector_store %arg18[%c0_36, %c0_37], %62 {strides = array<i32>} : memref<8x64xf32, #tpu.memory_space<vmem>>, vector<8x64xf32>,
    %c0_38 = arith.constant 0 : index
    %c0_39 = arith.constant 0 : index
    %64 = vector.load %arg19[%c0_38, %c0_39] : memref<8x64xf32, #tpu.memory_space<vmem>>, vector<8x64xf32>
    tpu.vector_store %arg19[%c0_38, %c0_39], %60 {strides = array<i32>} : memref<8x64xf32, #tpu.memory_space<vmem>>, vector<8x64xf32>,
    %c0_40 = arith.constant 0 : index
    %c0_41 = arith.constant 0 : index
    %65 = vector.load %arg20[%c0_40, %c0_41] : memref<8x1024xf32, #tpu.memory_space<vmem>>, vector<8x1024xf32>
    %66 = arith.truncf %62 : vector<8x64xf32> to vector<8x64xbf16>
    %c0_42 = arith.constant 0 : index
    %c0_43 = arith.constant 0 : index
    %c0_44 = arith.constant 0 : index
    %67 = vector.load %arg9[%c0_42, %c0_43, %c0_44] : memref<1x64x1024xbf16, #tpu.memory_space<vmem>>, vector<1x64x1024xbf16>
    %68 = vector.shape_cast %67 : vector<1x64x1024xbf16> to vector<64x1024xbf16>
    %cst_45 = arith.constant dense<0.000000e+00> : vector<8x1024xf32>
    %69 = tpu.matmul %66, %68, %cst_45 {dimension_numbers = #tpu.dot_dimension_numbers<[1], [0], [0], [1], [0, 0, 1, 1], [], []>} : vector<8x64xbf16>, vector<64x1024xbf16>, vector<8x1024xf32> -> vector<8x1024xf32>
    %70 = arith.addf %65, %69 : vector<8x1024xf32>
    %c0_46 = arith.constant 0 : index
    %c0_47 = arith.constant 0 : index
    %71 = vector.load %arg20[%c0_46, %c0_47] : memref<8x1024xf32, #tpu.memory_space<vmem>>, vector<8x1024xf32>
    tpu.vector_store %arg20[%c0_46, %c0_47], %70 {strides = array<i32>} : memref<8x1024xf32, #tpu.memory_space<vmem>>, vector<8x1024xf32>,
    %c7_i32 = arith.constant 7 : i32
    %72 = arith.cmpi eq, %arg1, %c7_i32 : i32
    %73 = arith.extui %72 : i1 to i32
    %c0_i32_48 = arith.constant 0 : i32
    %74 = arith.cmpi ne, %73, %c0_i32_48 : i32
    scf.if %74 {
      %c0_49 = arith.constant 0 : index
      %c0_50 = arith.constant 0 : index
      %75 = vector.load %arg20[%c0_49, %c0_50] : memref<8x1024xf32, #tpu.memory_space<vmem>>, vector<8x1024xf32>
      %c0_51 = arith.constant 0 : index
      %c0_52 = arith.constant 0 : index
      %76 = vector.load %arg10[%c0_51, %c0_52] : memref<1x1024xf32, #tpu.memory_space<vmem>>, vector<1x1024xf32>
      %77 = vector.broadcast %76 : vector<1x1024xf32> to vector<8x1024xf32>
      %78 = arith.addf %75, %77 : vector<8x1024xf32>
      %cst_53 = arith.constant 0.000000e+00 : f32
      %79 = vector.broadcast %cst_53 : f32 to vector<8x1024xf32>
      %80 = arith.cmpf oge, %78, %79 : vector<8x1024xf32>
      %cst_54 = arith.constant 0.229166672 : f32
      %81 = vector.broadcast %cst_54 : f32 to vector<8x1024xf32>
      %82 = arith.mulf %78, %81 : vector<8x1024xf32>
      %83 = arith.select %80, %78, %82 : vector<8x1024xi1>, vector<8x1024xf32>
      %84 = vector.extract_strided_slice %83 {offsets = [0, 0], sizes = [8, 256], strides = [1, 1]} : vector<8x1024xf32> to vector<8x256xf32>
      %85 = vector.extract_strided_slice %83 {offsets = [0, 256], sizes = [8, 256], strides = [1, 1]} : vector<8x1024xf32> to vector<8x256xf32>
      %86 = arith.maximumf %84, %85 : vector<8x256xf32>
      %87 = vector.extract_strided_slice %83 {offsets = [0, 512], sizes = [8, 256], strides = [1, 1]} : vector<8x1024xf32> to vector<8x256xf32>
      %88 = vector.extract_strided_slice %83 {offsets = [0, 768], sizes = [8, 256], strides = [1, 1]} : vector<8x1024xf32> to vector<8x256xf32>
      %89 = arith.maximumf %87, %88 : vector<8x256xf32>
      %90 = arith.maximumf %86, %89 : vector<8x256xf32>
      %91 = arith.truncf %90 : vector<8x256xf32> to vector<8x256xbf16>
      %c0_55 = arith.constant 0 : index
      %c0_56 = arith.constant 0 : index
      %92 = vector.load %arg11[%c0_55, %c0_56] : memref<256x128xbf16, #tpu.memory_space<vmem>>, vector<256x128xbf16>
      %cst_57 = arith.constant dense<0.000000e+00> : vector<8x128xf32>
      %93 = tpu.matmul %91, %92, %cst_57 {dimension_numbers = #tpu.dot_dimension_numbers<[1], [0], [0], [1], [0, 0, 1, 1], [], []>} : vector<8x256xbf16>, vector<256x128xbf16>, vector<8x128xf32> -> vector<8x128xf32>
      %c0_58 = arith.constant 0 : index
      %c0_59 = arith.constant 0 : index
      %94 = vector.load %arg12[%c0_58, %c0_59] : memref<1x128xf32, #tpu.memory_space<vmem>>, vector<1x128xf32>
      %95 = vector.broadcast %94 : vector<1x128xf32> to vector<8x128xf32>
      %96 = arith.addf %93, %95 : vector<8x128xf32>
      %cst_60 = arith.constant 0.000000e+00 : f32
      %97 = vector.broadcast %cst_60 : f32 to vector<8x128xf32>
      %98 = arith.cmpf oge, %96, %97 : vector<8x128xf32>
      %cst_61 = arith.constant 0.229166672 : f32
      %99 = vector.broadcast %cst_61 : f32 to vector<8x128xf32>
      %100 = arith.mulf %96, %99 : vector<8x128xf32>
      %101 = arith.select %98, %96, %100 : vector<8x128xi1>, vector<8x128xf32>
      %c0_62 = arith.constant 0 : index
      %c0_63 = arith.constant 0 : index
      %102 = vector.load %arg13[%c0_62, %c0_63] : memref<1x128xf32, #tpu.memory_space<vmem>>, vector<1x128xf32>
      %103 = vector.broadcast %102 : vector<1x128xf32> to vector<8x128xf32>
      %104 = arith.mulf %101, %103 : vector<8x128xf32>
      %c0_64 = arith.constant 0 : index
      %c0_65 = arith.constant 0 : index
      %105 = vector.load %arg14[%c0_64, %c0_65] : memref<1x128xf32, #tpu.memory_space<vmem>>, vector<1x128xf32>
      %106 = vector.broadcast %105 : vector<1x128xf32> to vector<8x128xf32>
      %107 = arith.addf %104, %106 : vector<8x128xf32>
      %c0_66 = arith.constant 0 : index
      %c0_67 = arith.constant 0 : index
      %108 = vector.load %arg15[%c0_66, %c0_67] : memref<8x128xf32, #tpu.memory_space<vmem>>, vector<8x128xf32>
      tpu.vector_store %arg15[%c0_66, %c0_67], %107 {strides = array<i32>} : memref<8x128xf32, #tpu.memory_space<vmem>>, vector<8x128xf32>,
    } else {
    }
    return
  }
  func.func @transform_0(%arg0: i32, %arg1: i32) -> (i32, i32, i32) {
    %c0_i32 = arith.constant 0 : i32
    %c0_i32_0 = arith.constant 0 : i32
    return %arg1, %arg0, %c0_i32 : i32, i32, i32
  }
  func.func @transform_1(%arg0: i32, %arg1: i32) -> (i32, i32) {
    %c0_i32 = arith.constant 0 : i32
    %c0_i32_0 = arith.constant 0 : i32
    %c0_i32_1 = arith.constant 0 : i32
    return %c0_i32, %c0_i32_0 : i32, i32
  }
  func.func @transform_2(%arg0: i32, %arg1: i32) -> (i32, i32) {
    %c0_i32 = arith.constant 0 : i32
    %c0_i32_0 = arith.constant 0 : i32
    %c0_i32_1 = arith.constant 0 : i32
    return %c0_i32, %c0_i32_0 : i32, i32
  }
  func.func @transform_3(%arg0: i32, %arg1: i32) -> (i32, i32) {
    %c0_i32 = arith.constant 0 : i32
    %c0_i32_0 = arith.constant 0 : i32
    %c0_i32_1 = arith.constant 0 : i32
    return %c0_i32, %c0_i32_0 : i32, i32
  }
  func.func @transform_4(%arg0: i32, %arg1: i32) -> (i32, i32) {
    %c0_i32 = arith.constant 0 : i32
    %c0_i32_0 = arith.constant 0 : i32
    %c0_i32_1 = arith.constant 0 : i32
    return %c0_i32, %c0_i32_0 : i32, i32
  }
  func.func @transform_5(%arg0: i32, %arg1: i32) -> (i32, i32) {
    %c0_i32 = arith.constant 0 : i32
    %c0_i32_0 = arith.constant 0 : i32
    %c0_i32_1 = arith.constant 0 : i32
    return %c0_i32, %c0_i32_0 : i32, i32
  }
  func.func @transform_6(%arg0: i32, %arg1: i32) -> (i32, i32) {
    %c0_i32 = arith.constant 0 : i32
    %c0_i32_0 = arith.constant 0 : i32
    %c0_i32_1 = arith.constant 0 : i32
    return %c0_i32, %c0_i32_0 : i32, i32
  }
  func.func @transform_7(%arg0: i32, %arg1: i32) -> (i32, i32, i32) {
    %c0_i32 = arith.constant 0 : i32
    %c0_i32_0 = arith.constant 0 : i32
    %c0_i32_1 = arith.constant 0 : i32
    return %arg1, %c0_i32, %c0_i32_0 : i32, i32, i32
  }
  func.func @transform_8(%arg0: i32, %arg1: i32) -> (i32, i32) {
    %c0_i32 = arith.constant 0 : i32
    %c0_i32_0 = arith.constant 0 : i32
    %c0_i32_1 = arith.constant 0 : i32
    return %c0_i32, %c0_i32_0 : i32, i32
  }
  func.func @transform_9(%arg0: i32, %arg1: i32) -> (i32, i32) {
    %c0_i32 = arith.constant 0 : i32
    %c0_i32_0 = arith.constant 0 : i32
    %c0_i32_1 = arith.constant 0 : i32
    return %c0_i32, %c0_i32_0 : i32, i32
  }
  func.func @transform_10(%arg0: i32, %arg1: i32) -> (i32, i32) {
    %c0_i32 = arith.constant 0 : i32
    %c0_i32_0 = arith.constant 0 : i32
    %c0_i32_1 = arith.constant 0 : i32
    return %c0_i32, %c0_i32_0 : i32, i32
  }
  func.func @transform_11(%arg0: i32, %arg1: i32) -> (i32, i32) {
    %c0_i32 = arith.constant 0 : i32
    %c0_i32_0 = arith.constant 0 : i32
    %c0_i32_1 = arith.constant 0 : i32
    return %c0_i32, %c0_i32_0 : i32, i32
  }
  func.func @transform_12(%arg0: i32, %arg1: i32) -> (i32, i32) {
    %c0_i32 = arith.constant 0 : i32
    %c0_i32_0 = arith.constant 0 : i32
    %c0_i32_1 = arith.constant 0 : i32
    return %c0_i32, %c0_i32_0 : i32, i32
  }
  func.func @transform_13(%arg0: i32, %arg1: i32) -> (i32, i32) {
    %c0_i32 = arith.constant 0 : i32
    %c0_i32_0 = arith.constant 0 : i32
    return %arg0, %c0_i32 : i32, i32
  }
}

</mosaic_0001>

<bundles_post_ra>
// kernel: lstm_cnn_encoder_forward.1
= control target key start
LH: loop header
LB: loop body
LE: loop exit
PB: predicated region body
PF: predicated region fallthrough
CT: control target
= control target key end

     0   :  { %s2509_s0 = inlined_call_operand.vmem [shape: f32[8,8,16], index: 0, kind: input, shape index: {}]   ;;  %s2510_s1 = inlined_call_operand.vmem [shape: f32[16,256], index: 1, kind: input, shape index: {}]   ;;  %s2511_s2 = inlined_call_operand.vmem [shape: f32[64,256], index: 2, kind: input, shape index: {}]   ;;  %s2512_s3 = inlined_call_operand.vmem [shape: f32[1,256], index: 3, kind: input, shape index: {}]   ;;  %s2513_s4 = inlined_call_operand.vmem [shape: f32[64,256], index: 4, kind: input, shape index: {}]   ;;  %s2514_s5 = inlined_call_operand.vmem [shape: f32[64,256], index: 5, kind: input, shape index: {}]   ;;  %s2515_s6 = inlined_call_operand.vmem [shape: f32[1,256], index: 6, kind: input, shape index: {}]   ;;  %s2516_s7 = inlined_call_operand.hbm [shape: bf16[8,64,1024], index: 7, kind: input, shape index: {}]   ;;  %s2517_s8 = inlined_call_operand.vmem [shape: f32[1,1024], index: 8, kind: input, shape index: {}]   ;;  %s2518_s9 = inlined_call_operand.vmem [shape: bf16[256,128], index: 9, kind: input, shape index: {}]   ;;  %s2519_s10 = inlined_call_operand.vmem [shape: f32[1,128], index: 10, kind: input, shape index: {}]   ;;  %s2520_s11 = inlined_call_operand.vmem [shape: f32[1,128], index: 11, kind: input, shape index: {}]   ;;  %s2521_s12 = inlined_call_operand.vmem [shape: f32[1,128], index: 12, kind: input, shape index: {}]   ;;  %s2522_s13 = inlined_call_operand.vmem [shape: f32[8,128], index: 13, kind: output, shape index: {}]  }
   0x1   :  { %2524 = sst [smem:[#allocation11_spill]] %s2519_s10 }
   0x2   :  { %2525 = sst [smem:[#allocation12_spill]] %s2520_s11 }
   0x3   :  { %2526 = sst [smem:[#allocation13_spill]] %s2521_s12 }
   0x4   :  { %2527 = sst [smem:[#allocation14_spill]] %s2522_s13 }
   0x5   :  { %18 = vsyncpa [#allocation8], 0 }
   0x6   :  { %20 = vsyncpa [#allocation8 + $0x1], 0  ;;  %s2090_s25 = smov 0   ;;  %s2092_s26 = smov 0  }
   0x7   :  { %s2094_s27 = smov 0   ;;  %s2096_s28 = smov 0  }
   0x8   :  { %s2098_s29 = smov 0   ;;  %s2100_s30 = smov 0  }
   0x9 LB: > { %s1734_s14 = sadd.s32 4294967295, %s2011_s30   ;;  %s35_s15 = sadd.s32 1, %s2007_s29  ;;  %s2011_s30 = sphi %s2100_s30, %s26_s30   ;;  %s2007_s29 = sphi %s2098_s29, %s2541_s29   ;;  %s2003_s28 = sphi %s2096_s28, %s2540_s28   ;;  %s1999_s27 = sphi %s2094_s27, %s2539_s27   ;;  %s1995_s26 = sphi %s2092_s26, %s2538_s26   ;;  %s1991_s25 = sphi %s2090_s25, %s2537_s25  }
   0xa   : > { %p36_p0 = scmp.ge.s32.totalorder %s35_s15, 8  ;;  %s199_s16 = sadd.s32 1, %s1999_s27 }
   0xb   : > { %p206_p1 = scmp.ne.s32.totalorder %s1999_s27, %s1995_s26  ;;  %p207_p2 = scmp.eq.s32.totalorder %s2011_s30, 0 }
   0xc   : > { %s2543_s15 = smov (%p36_p0, %s35_s15), 0  ;;  %p212_p4 = scmp.ne.s32.totalorder %s1995_s26, %s1991_s25 }
   0xd   : > { %2528 = sst [smem:[#allocation10_spill]] %s2543_s15  ;;  %p2126_p3 = por %p207_p2, %p206_p1 }
   0xe   : > { %s196_s18 = ssub.s32 %s2007_s29, %s2543_s15  ;;  %p213_p5 = scmp.eq.s32.totalorder %s1734_s14, 0 }
   0xf   : > { %p197_p6 = scmp.eq.s32.totalorder %s196_s18, 0  ;;  %p1842_p8 = scmp.lt.s32.totalorder %s2011_s30, 8 }
  0x10   : > { %p2133_p7 = por %p213_p5, %p212_p4  ;;  %s410_s21 = sand.u32 1, %s1999_s27  }
  0x11   : > { %s2139_s20 = scalar_select %p197_p6, %s1999_s27, %s199_s16  }
  0x12   : > { %s1813_s22 = sshll.u32 %s2007_s29, 12  ;;  %s1737_s23 = sshll.u32 %s410_s21, 8 }
  0x13   : > { %s420_s12 = scalar_lea.hbm %s2516_s7, %s1813_s22  ;;  %s414_s11 = scalar_lea.vmem [#allocation7], %s1737_s23 }
  0x14   : > { %s421_s10 = sshll.u32 %s414_s11, 4  ;;  %p2148_p9 = pnand %p1842_p8, %p2126_p3  ;;  %s422_s10 = int_to_ptr.vmem [resolvable:$true] %s421_s10 }
  0x15   : > { %s411_s14 = scalar_lea.sflag [#allocation8], %s410_s21  ;;  %s1946_s16 = scalar_lea.vmem %s422_s10, 4096 }
  0x16   : > { %p1935_p10 = pneg %p2148_p9  ;;  %p1947_p11 = scmp.ne.s32.totalorder %s422_s10, %s1946_s16 }
  0x17   : > { %s2013_s18 = smov [#allocation7]  }
  0x18   : > { %p1949_p12 = pnand %p1947_p11, %p1935_p10  ;;  %s1951_s15 = sshll.u32 %s2013_s18, 4  ;;  %s1952_s15 = int_to_ptr.vmem [resolvable:$false] %s1951_s15 }
  0x19   : > { %s1953_s13 = scalar_lea.vmem %s1952_s15, 8192  ;;  %p1954_p0 = scmp.lt.s32.totalorder %s422_s10, %s1952_s15 }
  0x1a   : > { %p1950_p13 = pneg %p1949_p12  ;;  %p1955_p1 = scmp.lt.s32.totalorder %s1953_s13, %s1946_s16 }
  0x1c   : > { %p1956_p2 = por %p1955_p1, %p1954_p0 }
  0x1e   : > { %p1957_p3 = pnand %p1956_p2, %p1950_p13 }
  0x20   : > { %1960 = shalt.err (!%p1957_p3)
}
  0x21   : > { %s2014_s11 = smov 512   ;;  %s2015_s17 = smov 32  }
  0x22   : > { %1841 = dma.hbm_to_vmem [thread:$0]  (!%p2148_p9), %s420_s12, 4096, %s422_s10, %s411_s14, %s2014_s11, %s2014_s11, %s2015_s17  }
  0x23   : > { %p1740_p4 = scmp.ge.s32.totalorder %s2011_s30, 1  ;;  %p429_p5 = scmp.lt.s32.totalorder %s2011_s30, 9 }
  0x25   : > { %p430_p6 = pnand %p1740_p4, %p429_p5 }
  0x26   : > { %s435_s21 = sand.u32 (!%p430_p6), 1, %s1995_s26  }
  0x27   : > { %433 = sbr.rel (%p430_p6) target bundleno = 1504 (0x5e0), region = 72  ;;  %s1741_s22 = sshll.u32 (!%p430_p6), %s435_s21, 8 }
  0x28   : > { %s436_s15 = scalar_lea.sflag (!%p430_p6), [#allocation8], %s435_s21  ;;  %s2159_s23 = scalar_lea.vmem (!%p430_p6), [#allocation7], %s1741_s22 }
  0x2c   : > { %1986 = dma.done.wait (%p2133_p7), %s436_s15, 4096  }
  0x2d   : > { %1988 = vsyncadd (%p2133_p7), %s436_s15, 4294963200  ;;  %p488_p8 = scmp.lt.s32.totalorder %s2003_s28, 7  ;;  %p1743_p9 = scmp.ne.s32.totalorder %s2003_s28, 0 }
  0x2f   : > { %s489_s10 = scalar_select %p488_p8, %s2003_s28, 7 }
  0x30   : > { %503 = sbr.rel (%p1743_p9) target bundleno = 60 (0x3c), region = 80 }
  0x31   : > { %s1742_s12 = sshll.u32 %s489_s10, 3 }
  0x32   : > { %s2170_s14 = scalar_lea.vmem %s2509_s0, %s1742_s12 }
  0x35   : > { %vm504_vm0 = vcmask 523264   ;;  %v2016_v0 = vmov 0.0  }
  0x36   : > { %505 = vst.msk [vmem:[#allocation2] sm:$0xff] %vm504_vm0, %v2016_v0  ;;  %506 = vst.msk [vmem:[#allocation3] sm:$0xff] %vm504_vm0, %v2016_v0 }
  0x37   : > { %507 = vst.msk [vmem:[#allocation4] sm:$0xff] %vm504_vm0, %v2016_v0  ;;  %508 = vst.msk [vmem:[#allocation5] sm:$0xff] %vm504_vm0, %v2016_v0 }
  0x38   : > { %509 = vst [vmem:[#allocation6 + $0x30] sm:$0xff] %v2016_v0  ;;  %510 = vst [vmem:[#allocation6] sm:$0xff] %v2016_v0 }
  0x39   : > { %511 = vst [vmem:[#allocation6 + $0x18] sm:$0xff] %v2016_v0  ;;  %512 = vst [vmem:[#allocation6 + $0x10] sm:$0xff] %v2016_v0 }
  0x3a   : > { %513 = vst [vmem:[#allocation6 + $0x8] sm:$0xff] %v2016_v0  ;;  %514 = vst [vmem:[#allocation6 + $0x20] sm:$0xff] %v2016_v0 }
  0x3b   : > { %515 = vst [vmem:[#allocation6 + $0x28] sm:$0xff] %v2016_v0  ;;  %516 = vst [vmem:[#allocation6 + $0x38] sm:$0xff] %v2016_v0 }
  0x3c PF: > { %v539_v1 = vld [vmem:[%s2511_s2 + $0x78] sm:$0xff]  ;;  %v538_v2 = vld [vmem:[%s2511_s2 + $0x70] sm:$0xff]  ;;  %v537_v3 = vld [vmem:[%s2511_s2 + $0x68] sm:$0xff]  ;;  %v2017_v5 = vmov 0.0   ;;  %vm615_vm1 = vcmask 130048   ;;  %s2018_s21 = smov 64   ;;  %v692_v25 = vlaneseq }
  0x3d   : > { %560 = vmatprep.subr.mxu0 %v539_v1  ;;  %v536_v4 = vld [vmem:[%s2511_s2 + $0x60] sm:$0xff]  ;;  %683 = vmatprep.mubr.f32.mxu1 %v2017_v5  ;;  %v535_v6 = vld [vmem:[%s2511_s2 + $0x58] sm:$0xff]  ;;  %v534_v7 = vld [vmem:[%s2511_s2 + $0x50] sm:$0xff]  ;;  %vm540_vm2 = vcmask 523264   ;;  %p1790_p7 = scmp.ne.s32.totalorder %s2003_s28, 7 }
  0x3e   : > { %561 = vmatpush1.msra.mxu0 %v538_v2  ;;  %608 = vmatprep.mubr.f32.mxu0 %v2017_v5  ;;  %v523_v8 = vld [vmem:[%s2510_s1 + $0x18] sm:$0xff]  ;;  %v533_v9 = vld [vmem:[%s2511_s2 + $0x48] sm:$0xff]  ;;  %v522_v10 = vld [vmem:[%s2510_s1 + $0x10] sm:$0xff]  ;;  %v2236_v26 = vshrl.u32 %v692_v25, 7  ;;  %s2533_s10 = sld [smem:[#allocation12_spill]] (!%p1790_p7) }
  0x3f   : > { %562 = vmatprep.subr.mxu0 %v537_v3  ;;  %647 = vmatprep.subr.mxu1 %v523_v8  ;;  %v532_v11 = vld [vmem:[%s2511_s2 + $0x40] sm:$0xff]  ;;  %v521_v12 = vld [vmem:[%s2510_s1 + $0x8] sm:$0xff]  ;;  %v531_v14 = vld [vmem:[%s2511_s2 + $0x38] sm:$0xff]  ;;  %s2534_s24 = sld [smem:[#allocation13_spill]] (!%p1790_p7) }
  0x40   : > { %563 = vmatpush1.msra.mxu0 %v536_v4  ;;  %648 = vmatpush1.msra.mxu1 %v522_v10  ;;  %v520_v13 = vld [vmem:[%s2510_s1] sm:$0xff]  ;;  %v530_v16 = vld [vmem:[%s2511_s2 + $0x30] sm:$0xff]  ;;  %v519_v17 = vld [vmem:[#allocation3] sm:$0xff]  ;;  %v2239_v27 = vsub.s32 0, %v2236_v26  ;;  %v2245_v29 = vsub.s32 1, %v2236_v26  ;;  %s2535_s16 = sld [smem:[#allocation14_spill]] (!%p1790_p7) }
  0x41   : > { %564 = vmatprep.subr.mxu0 %v535_v6  ;;  %649 = vmatprep.subr.mxu1 %v521_v12  ;;  %v517_v15 = vld [vmem:[%s2170_s14] sm:$0xff]  ;;  %v529_v18 = vld [vmem:[%s2511_s2 + $0x28] sm:$0xff]  ;;  %v527_v20 = vld [vmem:[%s2511_s2 + $0x18] sm:$0xff]  ;;  %s2532_s14 = sld [smem:[#allocation11_spill]] (!%p1790_p7) }
  0x42   : > { %565 = vmatpush1.msra.mxu0 %v534_v7  ;;  %650 = vmatpush1.msra.mxu1 %v520_v13  ;;  %v528_v19 = vld [vmem:[%s2511_s2 + $0x20] sm:$0xff]  ;;  %v526_v21 = vld [vmem:[%s2511_s2 + $0x10] sm:$0xff]  ;;  %v525_v22 = vld [vmem:[%s2511_s2 + $0x8] sm:$0xff] }
  0x43   : > { %566 = vmatprep.subr.mxu0 %v533_v9  ;;  %1745 = vmatmul.mubr.msk.f32.vlgmr.msra.gmra.mxu1 %vm615_vm1, %v517_v15  ;;  %v524_v23 = vld [vmem:[%s2511_s2] sm:$0xff]  ;;  %v774_v51 = vld [vmem:[%s2514_s5 + $0x78] sm:$0xff]  ;;  %v773_v52 = vld [vmem:[%s2514_s5 + $0x70] sm:$0xff] }
  0x44   : > { %567 = vmatpush1.msra.mxu0 %v532_v11  ;;  %719 = vrot.lane.b32.xlu0 %v519_v17, %s2018_s21  ;;  %v518_v24 = vld [vmem:[#allocation2] sm:$0xff]  ;;  %v772_v53 = vld [vmem:[%s2514_s5 + $0x68] sm:$0xff]  ;;  %v758_v54 = vld [vmem:[%s2513_s4 + $0x78] sm:$0xff] }
  0x45   : > { %568 = vmatprep.subr.mxu0 %v531_v14  ;;  %842 = vmatprep.mubr.f32.mxu1 %v2017_v5  ;;  %v690_v28 = vld [vmem:[%s2512_s3] sm:$0x3]  ;;  %v757_v56 = vld [vmem:[%s2513_s4 + $0x70] sm:$0xff]  ;;  %v770_v57 = vld [vmem:[%s2514_s5 + $0x58] sm:$0xff] }
  0x46   : > { %569 = vmatpush1.msra.mxu0 %v530_v16  ;;  %v695_v31 = vrot.slane %v690_v28, %v2239_v27  ;;  %v699_v34 = vrot.slane %v690_v28, %v2245_v29  ;;  %794 = vmatprep.subr.mxu1 %v774_v51  ;;  %v771_v55 = vld [vmem:[%s2514_s5 + $0x60] sm:$0xff]  ;;  %v756_v58 = vld [vmem:[%s2513_s4 + $0x68] sm:$0xff]  ;;  %v769_v59 = vld [vmem:[%s2514_s5 + $0x50] sm:$0xff] }
  0x47   : > { %570 = vmatprep.subr.mxu0 %v529_v18  ;;  %795 = vmatpush1.msra.mxu1 %v773_v52  ;;  %v755_v60 = vld [vmem:[%s2513_s4 + $0x60] sm:$0xff]  ;;  %v754_v61 = vld [vmem:[%s2513_s4 + $0x58] sm:$0xff]  ;;  %v768_v62 = vld [vmem:[%s2514_s5 + $0x48] sm:$0xff] }
  0x48   : > { %571 = vmatpush1.msra.mxu0 %v528_v19  ;;  %796 = vmatprep.subr.mxu1 %v772_v53  ;;  %v753_v63 = vld [vmem:[%s2513_s4 + $0x50] sm:$0xff]  ;;  %v767_v0 = vld [vmem:[%s2514_s5 + $0x40] sm:$0xff]  ;;  %v752_v1 = vld [vmem:[%s2513_s4 + $0x48] sm:$0xff] }
  0x49   : > { %572 = vmatprep.subr.mxu0 %v527_v20  ;;  %797 = vmatpush1.msra.mxu1 %v771_v55  ;;  %v766_v2 = vld [vmem:[%s2514_s5 + $0x38] sm:$0xff]  ;;  %v751_v3 = vld [vmem:[%s2513_s4 + $0x40] sm:$0xff]  ;;  %v765_v4 = vld [vmem:[%s2514_s5 + $0x30] sm:$0xff] }
  0x4a   : > { %573 = vmatpush1.msra.mxu0 %v526_v21  ;;  %798 = vmatprep.subr.mxu1 %v770_v57  ;;  %v764_v6 = vld [vmem:[%s2514_s5 + $0x28] sm:$0xff]  ;;  %v749_v7 = vld [vmem:[%s2513_s4 + $0x30] sm:$0xff]  ;;  %v763_v8 = vld [vmem:[%s2514_s5 + $0x20] sm:$0xff] }
  0x4b   : > { %574 = vmatprep.subr.mxu0 %v525_v22  ;;  %799 = vmatpush1.msra.mxu1 %v769_v59  ;;  %v748_v9 = vld [vmem:[%s2513_s4 + $0x28] sm:$0xff]  ;;  %v762_v10 = vld [vmem:[%s2514_s5 + $0x18] sm:$0xff]  ;;  %v747_v11 = vld [vmem:[%s2513_s4 + $0x20] sm:$0xff] }
  0x4c   : > { %575 = vmatpush1.msra.mxu0 %v524_v23  ;;  %800 = vmatprep.subr.mxu1 %v768_v62  ;;  %v761_v12 = vld [vmem:[%s2514_s5 + $0x10] sm:$0xff]  ;;  %v746_v13 = vld [vmem:[%s2513_s4 + $0x18] sm:$0xff]  ;;  %v760_v14 = vld [vmem:[%s2514_s5 + $0x8] sm:$0xff] }
  0x4d   : > { %1744 = vmatmul.mubr.msk.f32.vlgmr.msra.gmra.mxu0 %vm540_vm2, %v518_v24  ;;  %867 = vmatprep.subr.mxu0 %v758_v54  ;;  %v745_v15 = vld [vmem:[%s2513_s4 + $0x10] sm:$0xff]  ;;  %v759_v16 = vld [vmem:[%s2514_s5] sm:$0xff]  ;;  %v744_v17 = vld [vmem:[%s2513_s4 + $0x8] sm:$0xff] }
  0x4e   : > { %915 = vmatprep.mubr.f32.mxu0 %v2017_v5  ;;  %868 = vmatpush1.msra.mxu0 %v757_v56  ;;  %v750_v5 = vld [vmem:[%s2513_s4 + $0x38] sm:$0xff]  ;;  %v741_v18 = vld [vmem:[#allocation4] sm:$0xff]  ;;  %v743_v19 = vld [vmem:[%s2513_s4] sm:$0xff] }
  0x4f   : > { %869 = vmatprep.subr.mxu0 %v756_v58  ;;  %801 = vmatpush1.msra.mxu1 %v767_v0  ;;  %v742_v28 = vld [vmem:[#allocation5] sm:$0xff]  ;;  %v1006_v53 = vld [vmem:[%s2159_s23 + $0xc0] sm:$0xff]  ;;  %v1007_v55 = vld [vmem:[%s2159_s23 + $0xc8] sm:$0xff] }
  0x50   : > { %870 = vmatpush1.msra.mxu0 %v755_v60  ;;  %802 = vmatprep.subr.mxu1 %v766_v2  ;;  %v1010_v54 = vld [vmem:[%s2159_s23 + $0xe0] sm:$0xff]  ;;  %v1011_v57 = vld [vmem:[%s2159_s23 + $0xe8] sm:$0xff] }
  0x51   : > { %871 = vmatprep.subr.mxu0 %v754_v61  ;;  %803 = vmatpush1.msra.mxu1 %v765_v4  ;;  %v1779_v56 = vcombine.high %v1006_v53, %v1010_v54  ;;  %v1778_v58 = vcombine.low %v1006_v53, %v1010_v54  ;;  %v1780_v59 = vcombine.low %v1007_v55, %v1011_v57  ;;  %v998_v61 = vld [vmem:[%s2159_s23 + $0x80] sm:$0xff]  ;;  %v2019_v4 = vmov 0  }
  0x52   : > { %872 = vmatpush1.msra.mxu0 %v753_v63  ;;  %804 = vmatprep.subr.mxu1 %v764_v6  ;;  %v1781_v60 = vcombine.high %v1007_v55, %v1011_v57  ;;  %v1002_v62 = vld [vmem:[%s2159_s23 + $0xa0] sm:$0xff]  ;;  %v999_v63 = vld [vmem:[%s2159_s23 + $0x88] sm:$0xff]  ;;  %v984_v57 = vld [vmem:[%s2159_s23 + $0x10] sm:$0xff] }
  0x53   : > { %873 = vmatprep.subr.mxu0 %v752_v1  ;;  %805 = vmatpush1.msra.mxu1 %v763_v8  ;;  %v1771_v0 = vcombine.high %v998_v61, %v1002_v62  ;;  %v1003_v1 = vld [vmem:[%s2159_s23 + $0xa8] sm:$0xff]  ;;  %v990_v2 = vld [vmem:[%s2159_s23 + $0x40] sm:$0xff] }
  0x54   : > { %874 = vmatpush1.msra.mxu0 %v751_v3  ;;  %806 = vmatprep.subr.mxu1 %v762_v10  ;;  %v994_v3 = vld [vmem:[%s2159_s23 + $0x60] sm:$0xff]  ;;  %v1773_v6 = vcombine.high %v999_v63, %v1003_v1  ;;  %v995_v8 = vld [vmem:[%s2159_s23 + $0x68] sm:$0xff] }
  0x55   : > { %875 = vmatprep.subr.mxu0 %v750_v5  ;;  %807 = vmatpush1.msra.mxu1 %v761_v12  ;;  %v1770_v5 = vcombine.low %v998_v61, %v1002_v62  ;;  %v1763_v10 = vcombine.high %v990_v2, %v994_v3  ;;  %v986_v12 = vld [vmem:[%s2159_s23 + $0x20] sm:$0xff]  ;;  %v989_v61 = vld [vmem:[%s2159_s23 + $0x38] sm:$0xff] }
  0x56   : > { %876 = vmatpush1.msra.mxu0 %v749_v7  ;;  %808 = vmatprep.subr.mxu1 %v760_v14  ;;  %v991_v7 = vld [vmem:[%s2159_s23 + $0x48] sm:$0xff]  ;;  %v1008_v14 = vld [vmem:[%s2159_s23 + $0xd0] sm:$0xff] }
  0x57   : > { %877 = vmatprep.subr.mxu0 %v748_v9  ;;  %809 = vmatpush1.msra.mxu1 %v759_v16  ;;  %v1772_v9 = vcombine.low %v999_v63, %v1003_v1  ;;  %v1009_v16 = vld [vmem:[%s2159_s23 + $0xd8] sm:$0xff] }
  0x58   : > { %878 = vmatpush1.msra.mxu0 %v747_v11  ;;  %1749 = vmatmul.mubr.msk.f32.vlgmr.msra.gmra.mxu1 %vm540_vm2, %v741_v18  ;;  %v982_v11 = vld [vmem:[%s2159_s23] sm:$0xff]  ;;  %v987_v18 = vld [vmem:[%s2159_s23 + $0x28] sm:$0xff] }
  0x59   : > { %879 = vmatprep.subr.mxu0 %v746_v13  ;;  %1188 = vmatprep.subr.bf16.mxu1 %v1779_v56  ;;  %v1765_v13 = vcombine.high %v991_v7, %v995_v8 }
  0x5a   : > { %880 = vmatpush1.msra.mxu0 %v745_v15  ;;  %1212 = vmatprep.mubr.bf16.mxu1 %v2019_v4  ;;  %v1012_v15 = vld [vmem:[%s2159_s23 + $0xf0] sm:$0xff] }
  0x5b   : > { %881 = vmatprep.subr.mxu0 %v744_v17  ;;  %1189 = vmatpush1.bf16.msra.mxu1 %v1778_v58  ;;  %v983_v17 = vld [vmem:[%s2159_s23 + $0x8] sm:$0xff] }
  0x5c   : > { %882 = vmatpush1.msra.mxu0 %v743_v19  ;;  %1190 = vmatprep.subr.bf16.mxu1 %v1771_v0  ;;  %v1782_v19 = vcombine.low %v1008_v14, %v1012_v15 }
  0x5d   : > { %1229 = vmatprep.subr.bf16.mxu0 %v1781_v60  ;;  %v985_v60 = vld [vmem:[%s2159_s23 + $0x18] sm:$0xff] }
  0x5e   : > { %v1761_v1 = vcombine.high %v985_v60, %v989_v61 }
  0x5f   : > { %1191 = vmatpush1.bf16.msra.mxu1 %v1770_v5  ;;  %v975_v5 = vld [vmem:[#allocation6 + $0x18] sm:$0xff] }
  0x60   : > { %1192 = vmatprep.subr.bf16.mxu1 %v1763_v10 }
  0xb6   : > { %v720_v20 = vpop.permute.xlu0 %719 }
 0x103   : > { %v685_v30 = vpop.f32.mrf.mxu1 }
 0x105   : > { %v687_v35 = vpop.f32.mrf.mxu1 }
 0x10d   : > { %v610_v32 = vpop.f32.mrf.mxu0 }
 0x10e   : > { %v686_v33 = vadd.f32 %v685_v30, %v610_v32 }
 0x10f   : > { %v612_v36 = vpop.f32.mrf.mxu0 }
 0x110   : > { %v702_v37 = vadd.f32 %v695_v31, %v686_v33  ;;  %v688_v38 = vadd.f32 %v687_v35, %v612_v36  ;;  %v922_v31 = vld [vmem:[%s2515_s6] sm:$0x3] }
 0x111   : > { %v927_v33 = vrot.slane %v922_v31, %v2239_v27  ;;  %v931_v36 = vrot.slane %v922_v31, %v2245_v29 }
 0x112   : > { %v1746_v39 = vmul.f32 -1.442695, %v702_v37  ;;  %v703_v40 = vadd.f32 %v699_v34, %v688_v38 }
 0x114   : > { %v1747_v41 = vmul.f32 -1.442695, %v703_v40  ;;  %1897 = vpow2.f32 %v1746_v39 }
 0x116   : > { %1899 = vpow2.f32 %v1747_v41 }
 0x118   : > { %v844_v32 = vpop.f32.mrf.mxu1 }
 0x11a   : > { %v846_v37 = vpop.f32.mrf.mxu1 }
 0x121   : > { %v1898_v42 = vpop.eup %1897 }
 0x122   : > { %v710_v45 = vadd.f32 1.0, %v1898_v42 }
 0x123   : > { %v1900_v43 = vpop.eup %1899 }
 0x124   : > { %v711_v44 = vadd.f32 1.0, %v1900_v43 }
 0x126   : > { %1901 = vrcp.f32 %v711_v44 }
 0x127   : > { %1903 = vrcp.f32 %v710_v45 }
 0x133   : > { %v2249_v46 = vpop.eup %1901 }
 0x134   : > { %v716_v47 = vmul.f32 2.0, %v2249_v46  ;;  %v2252_v49 = vpop.eup %1903 }
 0x135   : > { %v722_v21 = vmul.f32 %v2252_v49, %v720_v20  ;;  %v1013_v20 = vld [vmem:[%s2159_s23 + $0xf8] sm:$0xff] }
 0x136   : > { %v1748_v48 = vadd.f32 -1.0, %v716_v47 }
 0x138   : > { %v723_v50 = vmul.f32 %v2252_v49, %v1748_v48 }
 0x13a   : > { %725 = vrot.lane.b32.xlu0 %v723_v50, %s2018_s21 }
 0x1ac   : > { %v726_v22 = vpop.permute.xlu0 %725 }
 0x1ad   : > { %v728_v23 = vadd.f32 %v726_v22, %v722_v21  ;;  %v1762_v22 = vcombine.low %v990_v2, %v994_v3  ;;  %v1760_v3 = vcombine.low %v985_v60, %v989_v61 }
 0x1af   : > { %1905 = vtanh.f32 %v728_v23  ;;  %1193 = vmatpush1.bf16.msra.mxu1 %v1762_v22 }
 0x1bc   : > { %v1906_v24 = vpop.eup %1905 }
 0x1bd   : > { %v730_v25 = vmul.f32 %v1906_v24, %v2249_v46  ;;  %v1764_v24 = vcombine.low %v991_v7, %v995_v8  ;;  %v974_v8 = vld [vmem:[#allocation6] sm:$0xff] }
 0x1bf   : > { %732 = vrot.lane.b32.xlu1 %v730_v25, %s2018_s21  ;;  %v1755_v25 = vcombine.high %v982_v11, %v986_v12 }
 0x1c1   : > { %1194 = vmatprep.subr.bf16.mxu1 %v1755_v25  ;;  %v980_v25 = vld [vmem:[#allocation6 + $0x38] sm:$0xff] }
 0x1c3   : > { %951 = vrot.lane.b32.xlu1 %v742_v28, %s2018_s21  ;;  %v1757_v28 = vcombine.high %v983_v17, %v987_v18 }
 0x231   : > { %v733_v30 = vpop.permute.xlu1 %732 }
 0x232   : > { %735 = vst.msk [vmem:[#allocation2] sm:$0xff] %vm540_vm2, %v733_v30  ;;  %1750 = vmatmul.mubr.msk.f32.vlgmr.msra.gmra.mxu0 %vm540_vm2, %v733_v30 }
 0x233   : > { %1230 = vmatpush1.bf16.msra.mxu0 %v1780_v59  ;;  %1253 = vmatprep.mubr.bf16.mxu0 %v2019_v4  ;;  %v988_v59 = vld [vmem:[%s2159_s23 + $0x30] sm:$0xff] }
 0x234   : > { %1231 = vmatprep.subr.bf16.mxu0 %v1773_v6  ;;  %v1759_v0 = vcombine.high %v984_v57, %v988_v59  ;;  %v1758_v2 = vcombine.low %v984_v57, %v988_v59 }
 0x235   : > { %v952_v21 = vpop.permute.xlu1 %951 }
 0x237   : > { %1232 = vmatpush1.bf16.msra.mxu0 %v1772_v9  ;;  %v976_v9 = vld [vmem:[#allocation6 + $0x10] sm:$0xff] }
 0x238   : > { %1233 = vmatprep.subr.bf16.mxu0 %v1765_v13 }
 0x23b   : > { %1234 = vmatpush1.bf16.msra.mxu0 %v1764_v24  ;;  %v978_v24 = vld [vmem:[#allocation6 + $0x20] sm:$0xff] }
 0x23c   : > { %1235 = vmatprep.subr.bf16.mxu0 %v1757_v28 }
 0x2f2   : > { %v917_v34 = vpop.f32.mrf.mxu0 }
 0x2f3   : > { %v918_v35 = vadd.f32 %v917_v34, %v844_v32  ;;  %v1754_v32 = vcombine.low %v982_v11, %v986_v12  ;;  %v1756_v34 = vcombine.low %v983_v17, %v987_v18 }
 0x2f4   : > { %v919_v38 = vpop.f32.mrf.mxu0 }
 0x2f5   : > { %v934_v39 = vadd.f32 %v927_v33, %v918_v35  ;;  %v920_v40 = vadd.f32 %v919_v38, %v846_v37  ;;  %v1783_v35 = vcombine.high %v1008_v14, %v1012_v15  ;;  %1195 = vmatpush1.bf16.msra.mxu1 %v1754_v32  ;;  %1236 = vmatpush1.bf16.msra.mxu0 %v1756_v34 }
 0x2f7   : > { %v1751_v41 = vmul.f32 -1.442695, %v934_v39  ;;  %v935_v42 = vadd.f32 %v931_v36, %v920_v40  ;;  %v1785_v36 = vcombine.high %v1009_v16, %v1013_v20  ;;  %1270 = vmatprep.subr.bf16.mxu1 %v1783_v35 }
 0x2f9   : > { %v1752_v43 = vmul.f32 -1.442695, %v935_v42  ;;  %1907 = vpow2.f32 %v1751_v41  ;;  %1311 = vmatprep.subr.bf16.mxu0 %v1785_v36  ;;  %v1000_v42 = vld [vmem:[%s2159_s23 + $0x90] sm:$0xff] }
 0x2fb   : > { %1909 = vpow2.f32 %v1752_v43  ;;  %v1004_v43 = vld [vmem:[%s2159_s23 + $0xb0] sm:$0xff] }
 0x2fc   : > { %v1774_v53 = vcombine.low %v1000_v42, %v1004_v43 }
 0x306   : > { %v1908_v44 = vpop.eup %1907 }
 0x307   : > { %v942_v47 = vadd.f32 1.0, %v1908_v44  ;;  %v1001_v44 = vld [vmem:[%s2159_s23 + $0x98] sm:$0xff] }
 0x308   : > { %v1910_v45 = vpop.eup %1909 }
 0x309   : > { %v943_v46 = vadd.f32 1.0, %v1910_v45  ;;  %v1005_v45 = vld [vmem:[%s2159_s23 + $0xb8] sm:$0xff] }
 0x30a   : > { %v1776_v54 = vcombine.low %v1001_v44, %v1005_v45 }
 0x30b   : > { %1911 = vrcp.f32 %v943_v46  ;;  %v1775_v46 = vcombine.high %v1000_v42, %v1004_v43 }
 0x30c   : > { %1913 = vrcp.f32 %v942_v47  ;;  %v1777_v47 = vcombine.high %v1001_v44, %v1005_v45 }
 0x318   : > { %v2364_v48 = vpop.eup %1911 }
 0x319   : > { %v948_v49 = vmul.f32 2.0, %v2364_v48  ;;  %v1914_v51 = vpop.eup %1913 }
 0x31a   : > { %v954_v30 = vmul.f32 %v1914_v51, %v952_v21  ;;  %v979_v21 = vld [vmem:[#allocation6 + $0x28] sm:$0xff] }
 0x31b   : > { %v1753_v50 = vadd.f32 -1.0, %v948_v49  ;;  %v992_v49 = vld [vmem:[%s2159_s23 + $0x50] sm:$0xff] }
 0x31d   : > { %v955_v52 = vmul.f32 %v1914_v51, %v1753_v50  ;;  %v993_v51 = vld [vmem:[%s2159_s23 + $0x58] sm:$0xff] }
 0x31f   : > { %957 = vrot.lane.b32.xlu0 %v955_v52, %s2018_s21  ;;  %v997_v52 = vld [vmem:[%s2159_s23 + $0x78] sm:$0xff] }
 0x320   : > { %v1769_v56 = vcombine.high %v993_v51, %v997_v52  ;;  %v1768_v63 = vcombine.low %v993_v51, %v997_v52 }
 0x323   : > { %737 = vrot.lane.b32.xlu0 %v728_v23, %s2018_s21  ;;  %v1784_v23 = vcombine.low %v1009_v16, %v1013_v20  ;;  %v977_v20 = vld [vmem:[#allocation6 + $0x8] sm:$0xff] }
 0x391   : > { %v958_v31 = vpop.permute.xlu0 %957 }
 0x392   : > { %v960_v33 = vadd.f32 %v958_v31, %v954_v30 }
 0x394   : > { %1915 = vtanh.f32 %v960_v33  ;;  %969 = vrot.lane.b32.xlu0 %v960_v33, %s2018_s21 }
 0x395   : > { %v738_v37 = vpop.permute.xlu0 %737 }
 0x396   : > { %740 = vst.msk [vmem:[#allocation3] sm:$0xff] %vm540_vm2, %v738_v37 }
 0x3a1   : > { %v1916_v38 = vpop.eup %1915 }
 0x3a2   : > { %v962_v39 = vmul.f32 %v1916_v38, %v2364_v48  ;;  %v996_v48 = vld [vmem:[%s2159_s23 + $0x70] sm:$0xff] }
 0x3a3   : > { %v1767_v55 = vcombine.high %v992_v49, %v996_v48  ;;  %v1766_v62 = vcombine.low %v992_v49, %v996_v48 }
 0x3a4   : > { %v981_v40 = vpack.c.bf16 %v962_v39, %v962_v39 }
 0x3a6   : > { %1015 = vrot.lane.b32.xlu1 %v981_v40, %s2018_s21 }
 0x3aa   : > { %964 = vrot.lane.b32.xlu1 %v962_v39, %s2018_s21 }
 0x406   : > { %v970_v41 = vpop.permute.xlu0 %969 }
 0x407   : > { %972 = vst.msk [vmem:[#allocation5] sm:$0xff] %vm540_vm2, %v970_v41 }
 0x418   : > { %v1016_v50 = vpop.permute.xlu1 %1015 }
 0x419   : > { %1786 = vmatmul.mubr.msk.bf16.vlgmr.msra.gmra.mxu1 %vm540_vm2, %v1016_v50  ;;  %1787 = vmatmul.mubr.msk.bf16.vlgmr.msra.gmra.mxu0 %vm540_vm2, %v1016_v50 }
 0x41a   : > { %1271 = vmatpush1.bf16.msra.mxu1 %v1782_v19  ;;  %1312 = vmatpush1.bf16.msra.mxu0 %v1784_v23 }
 0x41b   : > { %1272 = vmatprep.subr.bf16.mxu1 %v1775_v46  ;;  %1313 = vmatprep.subr.bf16.mxu0 %v1777_v47 }
 0x41c   : > { %v965_v58 = vpop.permute.xlu1 %964  ;;  %1294 = vmatprep.mubr.bf16.mxu1 %v2019_v4  ;;  %1335 = vmatprep.mubr.bf16.mxu0 %v2019_v4  ;;  %v973_v4 = vld [vmem:[#allocation6 + $0x30] sm:$0xff] }
 0x41d   : > { %967 = vst.msk [vmem:[#allocation4] sm:$0xff] %vm540_vm2, %v965_v58 }
 0x41e   : > { %1273 = vmatpush1.bf16.msra.mxu1 %v1774_v53  ;;  %1314 = vmatpush1.bf16.msra.mxu0 %v1776_v54 }
 0x41f   : > { %1274 = vmatprep.subr.bf16.mxu1 %v1767_v55  ;;  %1315 = vmatprep.subr.bf16.mxu0 %v1769_v56 }
 0x422   : > { %1275 = vmatpush1.bf16.msra.mxu1 %v1766_v62  ;;  %1316 = vmatpush1.bf16.msra.mxu0 %v1768_v63 }
 0x423   : > { %1276 = vmatprep.subr.bf16.mxu1 %v1759_v0  ;;  %1317 = vmatprep.subr.bf16.mxu0 %v1761_v1 }
 0x426   : > { %1277 = vmatpush1.bf16.msra.mxu1 %v1758_v2  ;;  %1318 = vmatpush1.bf16.msra.mxu0 %v1760_v3 }
 0x429   : > { %1788 = vmatmul.mubr.msk.bf16.vlgmr.msra.gmra.mxu1 %vm540_vm2, %v1016_v50  ;;  %1789 = vmatmul.mubr.msk.bf16.vlgmr.msra.gmra.mxu0 %vm540_vm2, %v1016_v50 }
 0x4d9   : > { %v1214_v6 = vpop.f32.mrf.mxu1  ;;  %v1255_v7 = vpop.f32.mrf.mxu0 }
 0x4da   : > { %v1344_v10 = vadd.f32 %v1214_v6, %v973_v4  ;;  %v1346_v11 = vadd.f32 %v1255_v7, %v975_v5 }
 0x4db   : > { %v1216_v12 = vpop.f32.mrf.mxu1  ;;  %v1257_v13 = vpop.f32.mrf.mxu0 }
 0x4dc   : > { %1352 = vst [vmem:[#allocation6 + $0x30] sm:$0xff] %v1344_v10  ;;  %1354 = vst [vmem:[#allocation6 + $0x18] sm:$0xff] %v1346_v11  ;;  %v1345_v14 = vadd.f32 %v1216_v12, %v974_v8  ;;  %v1347_v15 = vadd.f32 %v1257_v13, %v976_v9 }
 0x4dd   : > { %v1218_v16 = vpop.f32.mrf.mxu1  ;;  %v1259_v17 = vpop.f32.mrf.mxu0 }
 0x4de   : > { %1353 = vst [vmem:[#allocation6] sm:$0xff] %v1345_v14  ;;  %1355 = vst [vmem:[#allocation6 + $0x10] sm:$0xff] %v1347_v15 }
 0x4df   : > { %v1219_v18 = vpop.f32.mrf.mxu1  ;;  %v1260_v19 = vpop.f32.mrf.mxu0 }
 0x4e9   : > { %v1296_v22 = vpop.f32.mrf.mxu1  ;;  %v1337_v23 = vpop.f32.mrf.mxu0 }
 0x4ea   : > { %v1348_v28 = vadd.f32 %v1296_v22, %v977_v20  ;;  %v1350_v30 = vadd.f32 %v1337_v23, %v979_v21 }
 0x4eb   : > { %v1298_v31 = vpop.f32.mrf.mxu1  ;;  %v1339_v32 = vpop.f32.mrf.mxu0  ;;  %1363 = sbr.rel (%p1790_p7) target bundleno = 1504 (0x5e0), region = 84 }
 0x4ec   : > { %1356 = vst [vmem:[#allocation6 + $0x8] sm:$0xff] %v1348_v28  ;;  %1358 = vst [vmem:[#allocation6 + $0x28] sm:$0xff] %v1350_v30  ;;  %v1349_v33 = vadd.f32 %v1298_v31, %v978_v24  ;;  %v1351_v34 = vadd.f32 %v1339_v32, %v980_v25 }
 0x4ed   : > { %v1300_v35 = vpop.f32.mrf.mxu1  ;;  %v1341_v36 = vpop.f32.mrf.mxu0 }
 0x4ee   : > { %1357 = vst [vmem:[#allocation6 + $0x20] sm:$0xff] %v1349_v33  ;;  %1359 = vst [vmem:[#allocation6 + $0x38] sm:$0xff] %v1351_v34 }
 0x4ef   : > { %v1301_v37 = vpop.f32.mrf.mxu1  ;;  %v1342_v38 = vpop.f32.mrf.mxu0 }
 0x4f0   : > { %v1917_v39 = vld [vmem:[%s2518_s9 + $0x78] sm:$0xff]   ;;  %v1919_v41 = vld [vmem:[%s2518_s9 + $0x70] sm:$0xff]   ;;  %v1921_v43 = vld [vmem:[%s2518_s9 + $0x68] sm:$0xff]   ;;  %v1388_v47 = vsub.s32 3, %v2236_v26  ;;  %v1396_v50 = vsub.s32 5, %v2236_v26  ;;  %v1404_v48 = vsub.s32 7, %v2236_v26 }
 0x4f1   : > { %v1918_v40 = vld [vmem:[%s2518_s9 + $0x38] sm:$0xff]   ;;  %1814 = vmatprep.subr.bf16.mxu0 %v1917_v39  ;;  %v1920_v42 = vld [vmem:[%s2518_s9 + $0x30] sm:$0xff]   ;;  %v1922_v44 = vld [vmem:[%s2518_s9 + $0x28] sm:$0xff]   ;;  %v1384_v51 = vsub.s32 2, %v2236_v26  ;;  %v1392_v53 = vsub.s32 4, %v2236_v26  ;;  %v1400_v55 = vsub.s32 6, %v2236_v26 }
 0x4f2   : > { %1815 = vmatpush3.bf16.msra.mxu0 %v1918_v40  ;;  %v1923_v45 = vld [vmem:[%s2518_s9 + $0x60] sm:$0xff]   ;;  %v1925_v49 = vld [vmem:[%s2518_s9 + $0x58] sm:$0xff]   ;;  %v1927_v54 = vld [vmem:[%s2518_s9 + $0x50] sm:$0xff]  }
 0x4f3   : > { %1816 = vmatprep.subr.bf16.mxu0 %v1919_v41  ;;  %v1924_v46 = vld [vmem:[%s2518_s9 + $0x20] sm:$0xff]   ;;  %v1926_v52 = vld [vmem:[%s2518_s9 + $0x18] sm:$0xff]   ;;  %v1367_v57 = vld [vmem:[#allocation6 + $0x10] sm:$0xff] }
 0x4f4   : > { %v1365_v56 = vld [vmem:[#allocation6] sm:$0xff]  ;;  %v1364_v61 = vld [vmem:[#allocation6 + $0x30] sm:$0xff]  ;;  %v1366_v2 = vld [vmem:[#allocation6 + $0x18] sm:$0xff] }
 0x4f5   : > { %v1369_v58 = vld [vmem:[#allocation6 + $0x20] sm:$0xff]  ;;  %v1371_v59 = vld [vmem:[#allocation6 + $0x38] sm:$0xff]  ;;  %v1368_v3 = vld [vmem:[#allocation6 + $0x8] sm:$0xff] }
 0x4f6   : > { %1817 = vmatpush3.bf16.msra.mxu0 %v1920_v42  ;;  %v1372_v60 = vld [vmem:[%s2517_s8] sm:$0xff]  ;;  %v1370_v4 = vld [vmem:[#allocation6 + $0x28] sm:$0xff]  ;;  %v1928_v26 = vld [vmem:[%s2518_s9 + $0x10] sm:$0xff]  }
 0x4f7   : > { %1818 = vmatprep.subr.bf16.mxu0 %v1921_v43  ;;  %v1381_v62 = vrot.slane %v1372_v60, %v2245_v29  ;;  %v1389_v63 = vrot.slane %v1372_v60, %v1388_v47  ;;  %v1397_v0 = vrot.slane %v1372_v60, %v1396_v50  ;;  %v1405_v1 = vrot.slane %v1372_v60, %v1404_v48  ;;  %v1929_v29 = vld [vmem:[%s2518_s9 + $0x48] sm:$0xff]   ;;  %v1931_v20 = vld [vmem:[%s2518_s9 + $0x40] sm:$0xff]  }
 0x4f8   : > { %v1377_v5 = vrot.slane %v1372_v60, %v2239_v27  ;;  %v1385_v6 = vrot.slane %v1372_v60, %v1384_v51  ;;  %v1393_v7 = vrot.slane %v1372_v60, %v1392_v53  ;;  %v1401_v8 = vrot.slane %v1372_v60, %v1400_v55  ;;  %v1930_v27 = vld [vmem:[%s2518_s9 + $0x8] sm:$0xff]   ;;  %v1932_v32 = vld [vmem:[%s2518_s9] sm:$0xff]  }
 0x4f9   : > { %v1415_v9 = vadd.f32 %v1381_v62, %v1365_v56  ;;  %v1417_v10 = vadd.f32 %v1389_v63, %v1367_v57  ;;  %v1419_v11 = vadd.f32 %v1397_v0, %v1369_v58  ;;  %v1421_v12 = vadd.f32 %v1405_v1, %v1371_v59  ;;  %v1791_v47 = vld [vmem:[%s2532_s14] ss:$0 sm:$0xff] }
 0x4fa   : > { %1819 = vmatpush3.bf16.msra.mxu0 %v1922_v44  ;;  %v1414_v13 = vadd.f32 %v1377_v5, %v1364_v61  ;;  %v1416_v14 = vadd.f32 %v1385_v6, %v1366_v2  ;;  %v1418_v15 = vadd.f32 %v1393_v7, %v1368_v3  ;;  %v1420_v16 = vadd.f32 %v1401_v8, %v1370_v4  ;;  %v1809_v56 = vld [vmem:[%s2534_s24] ss:$0 sm:$0xff] }
 0x4fb   : > { %1820 = vmatprep.subr.bf16.mxu0 %v1923_v45  ;;  %vm1423_vm3 = vcmp.ge.f32.partialorder %v1415_v9, 0.0  ;;  %vm1425_vm4 = vcmp.ge.f32.partialorder %v1417_v10, 0.0  ;;  %vm1427_vm5 = vcmp.ge.f32.partialorder %v1419_v11, 0.0  ;;  %vm1429_vm6 = vcmp.ge.f32.partialorder %v1421_v12, 0.0 }
 0x4fc   : > { %v1431_v17 = vmul.f32 0.22916667, %v1415_v9  ;;  %v1433_v18 = vmul.f32 0.22916667, %v1417_v10  ;;  %v1435_v19 = vmul.f32 0.22916667, %v1419_v11 }
 0x4fd   : > { %v1437_v21 = vmul.f32 0.22916667, %v1421_v12  ;;  %vm1422_vm7 = vcmp.ge.f32.partialorder %v1414_v13, 0.0  ;;  %vm1424_vm8 = vcmp.ge.f32.partialorder %v1416_v14, 0.0  ;;  %vm1426_vm9 = vcmp.ge.f32.partialorder %v1418_v15, 0.0 }
 0x4fe   : > { %1821 = vmatpush3.bf16.msra.mxu0 %v1924_v46  ;;  %v1439_v22 = vsel %vm1423_vm3, %v1415_v9, %v1431_v17  ;;  %v1441_v23 = vsel %vm1425_vm4, %v1417_v10, %v1433_v18  ;;  %v1443_v24 = vsel %vm1427_vm5, %v1419_v11, %v1435_v19  ;;  %vm1428_vm10 = vcmp.ge.f32.partialorder %v1420_v16, 0.0 }
 0x4ff   : > { %1822 = vmatprep.subr.bf16.mxu0 %v1925_v49  ;;  %v1445_v25 = vsel %vm1429_vm6, %v1421_v12, %v1437_v21  ;;  %v1447_v28 = vmax.f32 %v1439_v22, %v1441_v23  ;;  %v1430_v30 = vmul.f32 0.22916667, %v1414_v13  ;;  %v1432_v31 = vmul.f32 0.22916667, %v1416_v14 }
 0x500   : > { %v1449_v33 = vmax.f32 %v1443_v24, %v1445_v25  ;;  %v1434_v34 = vmul.f32 0.22916667, %v1418_v15  ;;  %v1436_v35 = vmul.f32 0.22916667, %v1420_v16 }
 0x501   : > { %v1438_v36 = vsel %vm1422_vm7, %v1414_v13, %v1430_v30  ;;  %v1440_v37 = vsel %vm1424_vm8, %v1416_v14, %v1432_v31 }
 0x502   : > { %1823 = vmatpush3.bf16.msra.mxu0 %v1926_v52  ;;  %v1451_v38 = vmax.f32 %v1447_v28, %v1449_v33  ;;  %v1442_v39 = vsel %vm1426_vm9, %v1418_v15, %v1434_v34  ;;  %v1444_v40 = vsel %vm1428_vm10, %v1420_v16, %v1436_v35  ;;  %v1446_v41 = vmax.f32 %v1438_v36, %v1440_v37 }
 0x503   : > { %1824 = vmatprep.subr.bf16.mxu0 %v1927_v54  ;;  %v1448_v42 = vmax.f32 %v1442_v39, %v1444_v40  ;;  %v1808_v54 = vld [vmem:[%s2533_s10] ss:$0 sm:$0xff] }
 0x504   : > { %v1453_v43 = vpack.c.bf16 %v1451_v38, %v1451_v38 }
 0x505   : > { %v1450_v44 = vmax.f32 %v1446_v41, %v1448_v42 }
 0x506   : > { %1825 = vmatpush3.bf16.msra.mxu0 %v1928_v26  ;;  %1621 = vmatprep.mubr.bf16.mxu0 %v1453_v43 }
 0x507   : > { %1826 = vmatprep.subr.bf16.mxu0 %v1929_v29  ;;  %v1452_v45 = vpack.c.bf16 %v1450_v44, %v1450_v44 }
 0x50a   : > { %1827 = vmatpush3.bf16.msra.mxu0 %v1930_v27 }
 0x50b   : > { %1828 = vmatprep.subr.bf16.mxu0 %v1931_v20 }
 0x50e   : > { %1829 = vmatpush3.bf16.msra.mxu0 %v1932_v32 }
 0x511   : > { %1622 = vmatmul.mubr.bf16.vlgmr.msra.gmra.mxu0 %v1452_v45 }
 0x5d1   : > { %v1830_v46 = vpop.f32.mrf.mxu0 }
 0x5d3   : > { %v1831_v49 = vpop.f32.mrf.mxu0 }
 0x5d4   : > { %v1832_v50 = vadd.f32 %v1831_v49, %v1830_v46 }
 0x5d5   : > { %v1833_v48 = vpop.f32.mrf.mxu0 }
 0x5d6   : > { %v1624_v51 = vadd.f32 %v1832_v50, %v1791_v47 }
 0x5d7   : > { %v1834_v52 = vpop.f32.mrf.mxu0 }
 0x5d8   : > { %vm1629_vm11 = vcmp.ge.f32.partialorder %v1624_v51, 0.0  ;;  %v1630_v53 = vmul.f32 0.22916667, %v1624_v51 }
 0x5da   : > { %v1631_v55 = vsel %vm1629_vm11, %v1624_v51, %v1630_v53 }
 0x5db   : > { %v1639_v57 = vmul.f32 %v1808_v54, %v1631_v55 }
 0x5dd   : > { %v1647_v58 = vadd.f32 %v1809_v56, %v1639_v57 }
 0x5df   : > { %1648 = vst [vmem:[%s2535_s16] sm:$0xff] %v1647_v58 }
 0x5e0 PF: > { %s26_s30 = sadd.s32 1, %s2011_s30   ;;  %s2536_s18 = sld [smem:[#allocation10_spill]] }
 0x5e1   : > { %p23_p10 = scmp.ge.s32.totalorder %s26_s30, 10   ;;  %s2537_s25 = smov %s1995_s26 }
 0x5e2   : > { %s2538_s26 = smov %s1999_s27  ;;  %s2539_s27 = smov %s2139_s20 }
 0x5e3   : > { %s2540_s28 = smov %s2007_s29  ;;  %25 = sbr.rel (!%p23_p10) target bundleno = 9 (0x9), region = 123 }
 0x5e6   : > { %s2541_s29 = smov %s2536_s18 }
 0x5e8   :  { %1668 = vsyncpa [#allocation8], 1 }
 0x5e9   :  { %1670 = vsyncpa [#allocation8 + $0x1], 1 }

</bundles_post_ra>
